<compile_context>
chip_gen: v7x
topology: tpu7x:2x2x1
jax: 0.10.0
libtpu: 0.0.40
codegen_flags: <defaults>
</compile_context>

<pallas_src>
import jax
import jax.numpy as jnp
import numpy as np
from jax.experimental import pallas as pl
from jax.experimental.pallas import tpu as pltpu

PIXEL_DIM = 8        # config.pixel_dim (descriptor size, matches the [0,0,1,1,1,1,1,1] mask)
PIX_PERWORD = 5      # pix_perword
POS_GRID = 64        # position_embeddings spatial size (1, pixel_dim, 64, 64)


def _vit_gaussian_pixels_kernel(x_ref, aux_ref, pos_ref, wmain_ref, wcoord_ref,
                                b_ref, out_ref):
    # x_ref      : (TR, 40)   cdt   words (5 pixels x 8 channels); coord lanes are
    #                               irrelevant because wmain has those rows zeroed
    # aux_ref    : (TR, 16)   i32   lanes 0-4: iy, 5-9: ix, 10-14: valid, 15: pad
    # pos_ref    : (64, 128)  cdt   [pos_ch0 | pos_ch1] along lanes
    # wmain_ref  : (40, Hp)   cdt   proj weight with the 10 coordinate rows zeroed
    # wcoord_ref : (16, Hp)   cdt   row 2j+c = proj_w[8j+c]; rows 10-15 zero
    # b_ref      : (1, Hp)    f32
    # out_ref    : (TR, Hp)   f32
    x = x_ref[...]
    rows = x.shape[0]
    cdt = wmain_ref.dtype

    # main projection of the kept channels (channel mask baked into wmain on the host)
    acc = jnp.dot(x, wmain_ref[...], preferred_element_type=jnp.float32)     # (TR, Hp) f32

    aux = aux_ref[...]                                                       # (TR, 16) i32
    pos = pos_ref[...]                                                       # (64, 128)

    iota64 = jax.lax.broadcasted_iota(jnp.int32, (rows, POS_GRID), 1)
    iota128 = jax.lax.broadcasted_iota(jnp.int32, (rows, 2 * POS_GRID), 1) & (POS_GRID - 1)

    # constant pieces of the per-pixel (128,16) half-lane -> coordinate-lane selector
    row_half = (jax.lax.broadcasted_iota(jnp.int32, (2 * POS_GRID, 16), 0)
                >= POS_GRID).astype(jnp.int32)                               # 0 | 1 per row
    col_id = jax.lax.broadcasted_iota(jnp.int32, (2 * POS_GRID, 16), 1)

    one = jnp.asarray(1.0, cdt)
    zero = jnp.asarray(0.0, cdt)

    coord = jnp.zeros((rows, 16), jnp.float32)
    for j in range(PIX_PERWORD):
        iy = aux[:, j:j + 1]                                                 # (TR, 1)
        ix = aux[:, PIX_PERWORD + j:PIX_PERWORD + j + 1]                     # (TR, 1)
        vb = aux[:, 2 * PIX_PERWORD + j:2 * PIX_PERWORD + j + 1] > 0         # (TR, 1) bool
        # stage A: one-hot over the table row iy, validity fused into the compare
        oh_y = jnp.where(jnp.logical_and(iota64 == iy, vb), one, zero)       # (TR, 64)
        rowv = jnp.dot(oh_y, pos, preferred_element_type=jnp.float32)        # (TR, 128) f32
        # stage B: pick column ix in both channel halves (mask fused into the select)
        masked = jnp.where(iota128 == ix, rowv, 0.0)                         # (TR, 128) f32
        # reduce each 64-lane half to its scalar: constant selector, cols 2j / 2j+1
        s_j = (col_id == (2 * j + row_half)).astype(jnp.float32)             # (128, 16)
        coord = coord + jnp.dot(masked, s_j, preferred_element_type=jnp.float32)

    # single small matmul against the 10 un-replicated coordinate weight rows
    acc = acc + jnp.dot(coord.astype(cdt), wcoord_ref[...],
                        preferred_element_type=jnp.float32)
    acc = acc + b_ref[...]
    out_ref[...] = acc.astype(out_ref.dtype)


def _round_up(a, m):
    return (a + m - 1) // m * m


def vit_embeddings_gaussian_pixels(pixel_values, params, pix_perword=PIX_PERWORD,
                                   compute_dtype=jnp.float32):
    """pixel_values: (B, n_pix, pixel_dim) f32. Returns (B, 1 + n_pix//pix_perword, H).

    compute_dtype: set to jnp.bfloat16 on v6e/v7x for MXU-native matmuls (f32
    accumulation is kept); default f32 keeps bit-level parity with the reference.
    """
    B, n_pix, d = pixel_values.shape
    assert d == PIXEL_DIM and n_pix % pix_perword == 0
    n_words = n_pix // pix_perword
    feat = pix_perword * d                                    # 40
    hidden = params["proj_w"].shape[1]
    hidden_p = _round_up(hidden, 128)                         # lane-dense output stores

    x = pixel_values.astype(jnp.float32)

    # --- cheap O(n_pix) nearest-neighbour index precompute in XLA ---
    # grid_sample(nearest, align_corners=True, padding='zeros')
    scale = (POS_GRID - 1) * 0.5
    cx, cy = x[..., 0], x[..., 1]
    ixf = jnp.round((cx + 1.0) * scale)                       # ties-to-even == torch nearbyint
    iyf = jnp.round((cy + 1.0) * scale)
    valid = ((ixf >= 0.0) & (ixf <= POS_GRID - 1.0) &
             (iyf >= 0.0) & (iyf <= POS_GRID - 1.0))
    # NaN coordinates: the comparisons above are False, so the sample is zeroed;
    # the clipped index below is then arbitrary but harmless (masked by valid==0).
    ix_i = jnp.clip(ixf, 0, POS_GRID - 1).astype(jnp.int32)
    iy_i = jnp.clip(iyf, 0, POS_GRID - 1).astype(jnp.int32)

    # --- flatten batch x words into one row axis, pack the aux indices ---
    total = B * n_words
    x_words = x.reshape(total, feat).astype(compute_dtype)
    aux = jnp.concatenate([
        iy_i.reshape(total, pix_perword),
        ix_i.reshape(total, pix_perword),
        valid.reshape(total, pix_perword).astype(jnp.int32),
        jnp.zeros((total, 1), jnp.int32),
    ], axis=1)                                                # (total, 16) i32

    # --- row tiling: aim for an even tile count >= 2 (v7x has 2 TensorCores and the
    # single "parallel" grid axis is what shards across them); cap tiles at 512 rows.
    n_tiles = max(1, -(-total // 512))
    if n_tiles > 1 and n_tiles % 2:
        n_tiles += 1
    TR = _round_up(-(-total // n_tiles), 8)
    padded = n_tiles * TR
    pad = padded - total
    if pad:
        x_words = jnp.pad(x_words, ((0, pad), (0, 0)))
        aux = jnp.pad(aux, ((0, pad), (0, 0)))

    # --- one-time host-side weight / table prep ---
    w = params["proj_w"].astype(jnp.float32)                  # (40, H) (= torch W.T)
    coord_rows = np.array([8 * j + c for j in range(pix_perword) for c in range(2)])
    keep = np.ones((feat, 1), np.float32)
    keep[coord_rows] = 0.0
    w_main = (w * jnp.asarray(keep))                          # coord rows zeroed
    w_main = jnp.pad(w_main, ((0, 0), (0, hidden_p - hidden))).astype(compute_dtype)
    w_coord = jnp.pad(w[coord_rows, :],                       # (10, H) -> (16, Hp)
                      ((0, 16 - 2 * pix_perword), (0, hidden_p - hidden))
                      ).astype(compute_dtype)

    pos01 = params["position_embeddings"][0, :2].astype(jnp.float32)   # (2, 64, 64)
    pos2 = jnp.concatenate([pos01[0], pos01[1]], axis=1).astype(compute_dtype)  # (64, 128)

    b = jnp.pad(params["proj_b"].reshape(1, hidden).astype(jnp.float32),
                ((0, 0), (0, hidden_p - hidden)))

    proj = pl.pallas_call(
        _vit_gaussian_pixels_kernel,
        out_shape=jax.ShapeDtypeStruct((padded, hidden_p), jnp.float32),
        grid_spec=pltpu.PrefetchScalarGridSpec(
            num_scalar_prefetch=0,
            grid=(n_tiles,),
            in_specs=[
                pl.BlockSpec((TR, feat), lambda i: (i, 0)),
                pl.BlockSpec((TR, 16), lambda i: (i, 0)),
                pl.BlockSpec((POS_GRID, 2 * POS_GRID), lambda i: (0, 0)),
                pl.BlockSpec((feat, hidden_p), lambda i: (0, 0)),
                pl.BlockSpec((16, hidden_p), lambda i: (0, 0)),
                pl.BlockSpec((1, hidden_p), lambda i: (0, 0)),
            ],
            out_specs=pl.BlockSpec((TR, hidden_p), lambda i: (i, 0)),
        ),
        compiler_params=pltpu.CompilerParams(
            dimension_semantics=("parallel",),
            vmem_limit_bytes=32 * 1024 * 1024),
    )(x_words, aux, pos2, w_main, w_coord, b)

    proj = proj[:total, :hidden].reshape(B, n_words, hidden)
    cls = jnp.broadcast_to(
        params["cls_token"].astype(jnp.float32).reshape(1, 1, hidden), (B, 1, hidden))
    return jnp.concatenate([cls, proj], axis=1)


def _reference(pixel_values, params, pix_perword=PIX_PERWORD):
    """Pure-JAX reference mirroring the PyTorch forward (bool_masked_pos=None)."""
    B, n_pix, d = pixel_values.shape
    emb = pixel_values.astype(jnp.float32)
    pos_tbl = params["position_embeddings"][0].astype(jnp.float32)   # (8, 64, 64)
    cx, cy = emb[..., 0], emb[..., 1]
    ix = jnp.round((cx + 1.0) * (POS_GRID - 1) * 0.5)
    iy = jnp.round((cy + 1.0) * (POS_GRID - 1) * 0.5)
    valid = (ix >= 0) & (ix <= POS_GRID - 1) & (iy >= 0) & (iy <= POS_GRID - 1)
    ixc = jnp.clip(ix.astype(jnp.int32), 0, POS_GRID - 1)
    iyc = jnp.clip(iy.astype(jnp.int32), 0, POS_GRID - 1)
    sampled = pos_tbl[:, iyc, ixc]                                   # (8, B, n_pix)
    sampled = jnp.where(valid[None], sampled, 0.0)
    pos_emb = jnp.transpose(sampled, (1, 2, 0))                      # (B, n_pix, 8)
    mask = jnp.array([0, 0, 1, 1, 1, 1, 1, 1], jnp.float32)
    mixed = emb * mask + pos_emb * (1.0 - mask)
    mixed = mixed.reshape(B, n_pix // pix_perword, pix_perword * d)
    proj = mixed @ params["proj_w"] + params["proj_b"]
    cls = jnp.broadcast_to(params["cls_token"], (B, 1, proj.shape[-1]))
    return jnp.concatenate([cls, proj], axis=1)


if __name__ == "__main__":
    key = jax.random.PRNGKey(0)
    k1, k2, k3, k4, k5 = jax.random.split(key, 5)

    B, n_pix, hidden = 2, 20, 32      # n_words = 4
    pixel_values = jax.random.uniform(
        k1, (B, n_pix, PIXEL_DIM), minval=-1.2, maxval=1.2, dtype=jnp.float32)

    params = {
        "cls_token": jax.random.normal(k2, (1, 1, hidden), dtype=jnp.float32),
        "position_embeddings": jax.random.normal(
            k3, (1, PIXEL_DIM, POS_GRID, POS_GRID), dtype=jnp.float32),
        # stored as (in_features, out_features) == torch weight transposed
        "proj_w": 0.05 * jax.random.normal(
            k4, (PIXEL_DIM * PIX_PERWORD, hidden), dtype=jnp.float32),
        "proj_b": 0.05 * jax.random.normal(k5, (hidden,), dtype=jnp.float32),
    }

    out = vit_embeddings_gaussian_pixels(pixel_values, params)
    out = jax.block_until_ready(out)

    ref = _reference(pixel_values, params)
    assert out.shape == (B, 1 + n_pix // PIX_PERWORD, hidden)
    np.testing.assert_allclose(np.asarray(out), np.asarray(ref), rtol=1e-4, atol=1e-4)

    print("KERNEL_OK")
</pallas_src>

<mosaic_0001>
module attributes {stable_mosaic.version = 11 : i64} {
  func.func @_vit_gaussian_pixels_kernel(%arg0: i32, %arg1: memref<8x40xf32, #tpu.memory_space<vmem>>, %arg2: memref<8x16xi32, #tpu.memory_space<vmem>>, %arg3: memref<64x128xf32, #tpu.memory_space<vmem>>, %arg4: memref<40x128xf32, #tpu.memory_space<vmem>>, %arg5: memref<16x128xf32, #tpu.memory_space<vmem>>, %arg6: memref<1x128xf32, #tpu.memory_space<vmem>>, %arg7: memref<8x128xf32, #tpu.memory_space<vmem>>) attributes {dimension_semantics = [#tpu.dimension_semantics<parallel>], iteration_bounds = array<i64: 1>, scalar_prefetch = 0 : i64, scratch_operands = 0 : i64, tpu.core_type = #tpu.core_type<tc>, window_params = [{transform_indices = @transform_0, window_bounds = array<i64: 8, 40>}, {transform_indices = @transform_1, window_bounds = array<i64: 8, 16>}, {pipeline_mode = #tpu.pipeline_mode<synchronous>, transform_indices = @transform_2, window_bounds = array<i64: 64, 128>}, {pipeline_mode = #tpu.pipeline_mode<synchronous>, transform_indices = @transform_3, window_bounds = array<i64: 40, 128>}, {pipeline_mode = #tpu.pipeline_mode<synchronous>, transform_indices = @transform_4, window_bounds = array<i64: 16, 128>}, {pipeline_mode = #tpu.pipeline_mode<synchronous>, transform_indices = @transform_5, window_bounds = array<i64: 1, 128>}, {transform_indices = @transform_6, window_bounds = array<i64: 8, 128>}]} {
    %c0 = arith.constant 0 : index
    %c0_0 = arith.constant 0 : index
    %0 = vector.load %arg1[%c0, %c0_0] : memref<8x40xf32, #tpu.memory_space<vmem>>, vector<8x40xf32>
    %c0_1 = arith.constant 0 : index
    %c0_2 = arith.constant 0 : index
    %1 = vector.load %arg4[%c0_1, %c0_2] : memref<40x128xf32, #tpu.memory_space<vmem>>, vector<40x128xf32>
    %cst = arith.constant dense<0.000000e+00> : vector<8x128xf32>
    %2 = tpu.matmul %0, %1, %cst {dimension_numbers = #tpu.dot_dimension_numbers<[1], [0], [0], [1], [0, 0, 1, 1], [], []>} : vector<8x40xf32>, vector<40x128xf32>, vector<8x128xf32> -> vector<8x128xf32>
    %c0_3 = arith.constant 0 : index
    %c0_4 = arith.constant 0 : index
    %3 = vector.load %arg2[%c0_3, %c0_4] : memref<8x16xi32, #tpu.memory_space<vmem>>, vector<8x16xi32>
    %c0_5 = arith.constant 0 : index
    %c0_6 = arith.constant 0 : index
    %4 = vector.load %arg3[%c0_5, %c0_6] : memref<64x128xf32, #tpu.memory_space<vmem>>, vector<64x128xf32>
    %5 = tpu.iota {dimensions = array<i32: 1>} : vector<8x64xi32>
    %6 = tpu.iota {dimensions = array<i32: 1>} : vector<8x128xi32>
    %c63_i32 = arith.constant 63 : i32
    %7 = vector.broadcast %c63_i32 : i32 to vector<8x128xi32>
    %8 = arith.andi %6, %7 : vector<8x128xi32>
    %9 = tpu.iota {dimensions = array<i32: 0>} : vector<128x16xi32>
    %c64_i32 = arith.constant 64 : i32
    %10 = vector.broadcast %c64_i32 : i32 to vector<128x16xi32>
    %11 = arith.cmpi sge, %9, %10 : vector<128x16xi32>
    %12 = arith.extui %11 : vector<128x16xi1> to vector<128x16xi32>
    %13 = tpu.iota {dimensions = array<i32: 1>} : vector<128x16xi32>
    %cst_7 = arith.constant 0.000000e+00 : f32
    %14 = vector.broadcast %cst_7 : f32 to vector<8x16xf32>
    %15 = vector.extract_strided_slice %3 {offsets = [0, 0], sizes = [8, 1], strides = [1, 1]} : vector<8x16xi32> to vector<8x1xi32>
    %16 = vector.extract_strided_slice %3 {offsets = [0, 5], sizes = [8, 1], strides = [1, 1]} : vector<8x16xi32> to vector<8x1xi32>
    %17 = vector.extract_strided_slice %3 {offsets = [0, 10], sizes = [8, 1], strides = [1, 1]} : vector<8x16xi32> to vector<8x1xi32>
    %c0_i32 = arith.constant 0 : i32
    %18 = vector.broadcast %c0_i32 : i32 to vector<8x1xi32>
    %19 = arith.cmpi sgt, %17, %18 : vector<8x1xi32>
    %20 = vector.broadcast %15 : vector<8x1xi32> to vector<8x64xi32>
    %21 = arith.cmpi eq, %5, %20 : vector<8x64xi32>
    %22 = vector.broadcast %19 : vector<8x1xi1> to vector<8x64xi1>
    %23 = arith.andi %21, %22 : vector<8x64xi1>
    %cst_8 = arith.constant 1.000000e+00 : f32
    %cst_9 = arith.constant 0.000000e+00 : f32
    %24 = vector.broadcast %cst_8 : f32 to vector<8x64xf32>
    %25 = vector.broadcast %cst_9 : f32 to vector<8x64xf32>
    %26 = arith.select %23, %24, %25 : vector<8x64xi1>, vector<8x64xf32>
    %cst_10 = arith.constant dense<0.000000e+00> : vector<8x128xf32>
    %27 = tpu.matmul %26, %4, %cst_10 {dimension_numbers = #tpu.dot_dimension_numbers<[1], [0], [0], [1], [0, 0, 1, 1], [], []>} : vector<8x64xf32>, vector<64x128xf32>, vector<8x128xf32> -> vector<8x128xf32>
    %28 = vector.broadcast %16 : vector<8x1xi32> to vector<8x128xi32>
    %29 = arith.cmpi eq, %8, %28 : vector<8x128xi32>
    %cst_11 = arith.constant 0.000000e+00 : f32
    %30 = vector.broadcast %cst_11 : f32 to vector<8x128xf32>
    %31 = arith.select %29, %27, %30 : vector<8x128xi1>, vector<8x128xf32>
    %c0_i32_12 = arith.constant 0 : i32
    %32 = vector.broadcast %c0_i32_12 : i32 to vector<128x16xi32>
    %33 = arith.addi %32, %12 : vector<128x16xi32>
    %34 = arith.cmpi eq, %13, %33 : vector<128x16xi32>
    %35 = arith.extui %34 : vector<128x16xi1> to vector<128x16xi32>
    %36 = arith.sitofp %35 : vector<128x16xi32> to vector<128x16xf32>
    %cst_13 = arith.constant dense<0.000000e+00> : vector<8x16xf32>
    %37 = tpu.matmul %31, %36, %cst_13 {dimension_numbers = #tpu.dot_dimension_numbers<[1], [0], [0], [1], [0, 0, 1, 1], [], []>} : vector<8x128xf32>, vector<128x16xf32>, vector<8x16xf32> -> vector<8x16xf32>
    %38 = arith.addf %14, %37 : vector<8x16xf32>
    %39 = vector.extract_strided_slice %3 {offsets = [0, 1], sizes = [8, 1], strides = [1, 1]} : vector<8x16xi32> to vector<8x1xi32>
    %40 = vector.extract_strided_slice %3 {offsets = [0, 6], sizes = [8, 1], strides = [1, 1]} : vector<8x16xi32> to vector<8x1xi32>
    %41 = vector.extract_strided_slice %3 {offsets = [0, 11], sizes = [8, 1], strides = [1, 1]} : vector<8x16xi32> to vector<8x1xi32>
    %c0_i32_14 = arith.constant 0 : i32
    %42 = vector.broadcast %c0_i32_14 : i32 to vector<8x1xi32>
    %43 = arith.cmpi sgt, %41, %42 : vector<8x1xi32>
    %44 = vector.broadcast %39 : vector<8x1xi32> to vector<8x64xi32>
    %45 = arith.cmpi eq, %5, %44 : vector<8x64xi32>
    %46 = vector.broadcast %43 : vector<8x1xi1> to vector<8x64xi1>
    %47 = arith.andi %45, %46 : vector<8x64xi1>
    %cst_15 = arith.constant 1.000000e+00 : f32
    %cst_16 = arith.constant 0.000000e+00 : f32
    %48 = vector.broadcast %cst_15 : f32 to vector<8x64xf32>
    %49 = vector.broadcast %cst_16 : f32 to vector<8x64xf32>
    %50 = arith.select %47, %48, %49 : vector<8x64xi1>, vector<8x64xf32>
    %cst_17 = arith.constant dense<0.000000e+00> : vector<8x128xf32>
    %51 = tpu.matmul %50, %4, %cst_17 {dimension_numbers = #tpu.dot_dimension_numbers<[1], [0], [0], [1], [0, 0, 1, 1], [], []>} : vector<8x64xf32>, vector<64x128xf32>, vector<8x128xf32> -> vector<8x128xf32>
    %52 = vector.broadcast %40 : vector<8x1xi32> to vector<8x128xi32>
    %53 = arith.cmpi eq, %8, %52 : vector<8x128xi32>
    %cst_18 = arith.constant 0.000000e+00 : f32
    %54 = vector.broadcast %cst_18 : f32 to vector<8x128xf32>
    %55 = arith.select %53, %51, %54 : vector<8x128xi1>, vector<8x128xf32>
    %c2_i32 = arith.constant 2 : i32
    %56 = vector.broadcast %c2_i32 : i32 to vector<128x16xi32>
    %57 = arith.addi %56, %12 : vector<128x16xi32>
    %58 = arith.cmpi eq, %13, %57 : vector<128x16xi32>
    %59 = arith.extui %58 : vector<128x16xi1> to vector<128x16xi32>
    %60 = arith.sitofp %59 : vector<128x16xi32> to vector<128x16xf32>
    %cst_19 = arith.constant dense<0.000000e+00> : vector<8x16xf32>
    %61 = tpu.matmul %55, %60, %cst_19 {dimension_numbers = #tpu.dot_dimension_numbers<[1], [0], [0], [1], [0, 0, 1, 1], [], []>} : vector<8x128xf32>, vector<128x16xf32>, vector<8x16xf32> -> vector<8x16xf32>
    %62 = arith.addf %38, %61 : vector<8x16xf32>
    %63 = vector.extract_strided_slice %3 {offsets = [0, 2], sizes = [8, 1], strides = [1, 1]} : vector<8x16xi32> to vector<8x1xi32>
    %64 = vector.extract_strided_slice %3 {offsets = [0, 7], sizes = [8, 1], strides = [1, 1]} : vector<8x16xi32> to vector<8x1xi32>
    %65 = vector.extract_strided_slice %3 {offsets = [0, 12], sizes = [8, 1], strides = [1, 1]} : vector<8x16xi32> to vector<8x1xi32>
    %c0_i32_20 = arith.constant 0 : i32
    %66 = vector.broadcast %c0_i32_20 : i32 to vector<8x1xi32>
    %67 = arith.cmpi sgt, %65, %66 : vector<8x1xi32>
    %68 = vector.broadcast %63 : vector<8x1xi32> to vector<8x64xi32>
    %69 = arith.cmpi eq, %5, %68 : vector<8x64xi32>
    %70 = vector.broadcast %67 : vector<8x1xi1> to vector<8x64xi1>
    %71 = arith.andi %69, %70 : vector<8x64xi1>
    %cst_21 = arith.constant 1.000000e+00 : f32
    %cst_22 = arith.constant 0.000000e+00 : f32
    %72 = vector.broadcast %cst_21 : f32 to vector<8x64xf32>
    %73 = vector.broadcast %cst_22 : f32 to vector<8x64xf32>
    %74 = arith.select %71, %72, %73 : vector<8x64xi1>, vector<8x64xf32>
    %cst_23 = arith.constant dense<0.000000e+00> : vector<8x128xf32>
    %75 = tpu.matmul %74, %4, %cst_23 {dimension_numbers = #tpu.dot_dimension_numbers<[1], [0], [0], [1], [0, 0, 1, 1], [], []>} : vector<8x64xf32>, vector<64x128xf32>, vector<8x128xf32> -> vector<8x128xf32>
    %76 = vector.broadcast %64 : vector<8x1xi32> to vector<8x128xi32>
    %77 = arith.cmpi eq, %8, %76 : vector<8x128xi32>
    %cst_24 = arith.constant 0.000000e+00 : f32
    %78 = vector.broadcast %cst_24 : f32 to vector<8x128xf32>
    %79 = arith.select %77, %75, %78 : vector<8x128xi1>, vector<8x128xf32>
    %c4_i32 = arith.constant 4 : i32
    %80 = vector.broadcast %c4_i32 : i32 to vector<128x16xi32>
    %81 = arith.addi %80, %12 : vector<128x16xi32>
    %82 = arith.cmpi eq, %13, %81 : vector<128x16xi32>
    %83 = arith.extui %82 : vector<128x16xi1> to vector<128x16xi32>
    %84 = arith.sitofp %83 : vector<128x16xi32> to vector<128x16xf32>
    %cst_25 = arith.constant dense<0.000000e+00> : vector<8x16xf32>
    %85 = tpu.matmul %79, %84, %cst_25 {dimension_numbers = #tpu.dot_dimension_numbers<[1], [0], [0], [1], [0, 0, 1, 1], [], []>} : vector<8x128xf32>, vector<128x16xf32>, vector<8x16xf32> -> vector<8x16xf32>
    %86 = arith.addf %62, %85 : vector<8x16xf32>
    %87 = vector.extract_strided_slice %3 {offsets = [0, 3], sizes = [8, 1], strides = [1, 1]} : vector<8x16xi32> to vector<8x1xi32>
    %88 = vector.extract_strided_slice %3 {offsets = [0, 8], sizes = [8, 1], strides = [1, 1]} : vector<8x16xi32> to vector<8x1xi32>
    %89 = vector.extract_strided_slice %3 {offsets = [0, 13], sizes = [8, 1], strides = [1, 1]} : vector<8x16xi32> to vector<8x1xi32>
    %c0_i32_26 = arith.constant 0 : i32
    %90 = vector.broadcast %c0_i32_26 : i32 to vector<8x1xi32>
    %91 = arith.cmpi sgt, %89, %90 : vector<8x1xi32>
    %92 = vector.broadcast %87 : vector<8x1xi32> to vector<8x64xi32>
    %93 = arith.cmpi eq, %5, %92 : vector<8x64xi32>
    %94 = vector.broadcast %91 : vector<8x1xi1> to vector<8x64xi1>
    %95 = arith.andi %93, %94 : vector<8x64xi1>
    %cst_27 = arith.constant 1.000000e+00 : f32
    %cst_28 = arith.constant 0.000000e+00 : f32
    %96 = vector.broadcast %cst_27 : f32 to vector<8x64xf32>
    %97 = vector.broadcast %cst_28 : f32 to vector<8x64xf32>
    %98 = arith.select %95, %96, %97 : vector<8x64xi1>, vector<8x64xf32>
    %cst_29 = arith.constant dense<0.000000e+00> : vector<8x128xf32>
    %99 = tpu.matmul %98, %4, %cst_29 {dimension_numbers = #tpu.dot_dimension_numbers<[1], [0], [0], [1], [0, 0, 1, 1], [], []>} : vector<8x64xf32>, vector<64x128xf32>, vector<8x128xf32> -> vector<8x128xf32>
    %100 = vector.broadcast %88 : vector<8x1xi32> to vector<8x128xi32>
    %101 = arith.cmpi eq, %8, %100 : vector<8x128xi32>
    %cst_30 = arith.constant 0.000000e+00 : f32
    %102 = vector.broadcast %cst_30 : f32 to vector<8x128xf32>
    %103 = arith.select %101, %99, %102 : vector<8x128xi1>, vector<8x128xf32>
    %c6_i32 = arith.constant 6 : i32
    %104 = vector.broadcast %c6_i32 : i32 to vector<128x16xi32>
    %105 = arith.addi %104, %12 : vector<128x16xi32>
    %106 = arith.cmpi eq, %13, %105 : vector<128x16xi32>
    %107 = arith.extui %106 : vector<128x16xi1> to vector<128x16xi32>
    %108 = arith.sitofp %107 : vector<128x16xi32> to vector<128x16xf32>
    %cst_31 = arith.constant dense<0.000000e+00> : vector<8x16xf32>
    %109 = tpu.matmul %103, %108, %cst_31 {dimension_numbers = #tpu.dot_dimension_numbers<[1], [0], [0], [1], [0, 0, 1, 1], [], []>} : vector<8x128xf32>, vector<128x16xf32>, vector<8x16xf32> -> vector<8x16xf32>
    %110 = arith.addf %86, %109 : vector<8x16xf32>
    %111 = vector.extract_strided_slice %3 {offsets = [0, 4], sizes = [8, 1], strides = [1, 1]} : vector<8x16xi32> to vector<8x1xi32>
    %112 = vector.extract_strided_slice %3 {offsets = [0, 9], sizes = [8, 1], strides = [1, 1]} : vector<8x16xi32> to vector<8x1xi32>
    %113 = vector.extract_strided_slice %3 {offsets = [0, 14], sizes = [8, 1], strides = [1, 1]} : vector<8x16xi32> to vector<8x1xi32>
    %c0_i32_32 = arith.constant 0 : i32
    %114 = vector.broadcast %c0_i32_32 : i32 to vector<8x1xi32>
    %115 = arith.cmpi sgt, %113, %114 : vector<8x1xi32>
    %116 = vector.broadcast %111 : vector<8x1xi32> to vector<8x64xi32>
    %117 = arith.cmpi eq, %5, %116 : vector<8x64xi32>
    %118 = vector.broadcast %115 : vector<8x1xi1> to vector<8x64xi1>
    %119 = arith.andi %117, %118 : vector<8x64xi1>
    %cst_33 = arith.constant 1.000000e+00 : f32
    %cst_34 = arith.constant 0.000000e+00 : f32
    %120 = vector.broadcast %cst_33 : f32 to vector<8x64xf32>
    %121 = vector.broadcast %cst_34 : f32 to vector<8x64xf32>
    %122 = arith.select %119, %120, %121 : vector<8x64xi1>, vector<8x64xf32>
    %cst_35 = arith.constant dense<0.000000e+00> : vector<8x128xf32>
    %123 = tpu.matmul %122, %4, %cst_35 {dimension_numbers = #tpu.dot_dimension_numbers<[1], [0], [0], [1], [0, 0, 1, 1], [], []>} : vector<8x64xf32>, vector<64x128xf32>, vector<8x128xf32> -> vector<8x128xf32>
    %124 = vector.broadcast %112 : vector<8x1xi32> to vector<8x128xi32>
    %125 = arith.cmpi eq, %8, %124 : vector<8x128xi32>
    %cst_36 = arith.constant 0.000000e+00 : f32
    %126 = vector.broadcast %cst_36 : f32 to vector<8x128xf32>
    %127 = arith.select %125, %123, %126 : vector<8x128xi1>, vector<8x128xf32>
    %c8_i32 = arith.constant 8 : i32
    %128 = vector.broadcast %c8_i32 : i32 to vector<128x16xi32>
    %129 = arith.addi %128, %12 : vector<128x16xi32>
    %130 = arith.cmpi eq, %13, %129 : vector<128x16xi32>
    %131 = arith.extui %130 : vector<128x16xi1> to vector<128x16xi32>
    %132 = arith.sitofp %131 : vector<128x16xi32> to vector<128x16xf32>
    %cst_37 = arith.constant dense<0.000000e+00> : vector<8x16xf32>
    %133 = tpu.matmul %127, %132, %cst_37 {dimension_numbers = #tpu.dot_dimension_numbers<[1], [0], [0], [1], [0, 0, 1, 1], [], []>} : vector<8x128xf32>, vector<128x16xf32>, vector<8x16xf32> -> vector<8x16xf32>
    %134 = arith.addf %110, %133 : vector<8x16xf32>
    %c0_38 = arith.constant 0 : index
    %c0_39 = arith.constant 0 : index
    %135 = vector.load %arg5[%c0_38, %c0_39] : memref<16x128xf32, #tpu.memory_space<vmem>>, vector<16x128xf32>
    %cst_40 = arith.constant dense<0.000000e+00> : vector<8x128xf32>
    %136 = tpu.matmul %134, %135, %cst_40 {dimension_numbers = #tpu.dot_dimension_numbers<[1], [0], [0], [1], [0, 0, 1, 1], [], []>} : vector<8x16xf32>, vector<16x128xf32>, vector<8x128xf32> -> vector<8x128xf32>
    %137 = arith.addf %2, %136 : vector<8x128xf32>
    %c0_41 = arith.constant 0 : index
    %c0_42 = arith.constant 0 : index
    %138 = vector.load %arg6[%c0_41, %c0_42] : memref<1x128xf32, #tpu.memory_space<vmem>>, vector<1x128xf32>
    %139 = vector.broadcast %138 : vector<1x128xf32> to vector<8x128xf32>
    %140 = arith.addf %137, %139 : vector<8x128xf32>
    %c0_43 = arith.constant 0 : index
    %c0_44 = arith.constant 0 : index
    %141 = vector.load %arg7[%c0_43, %c0_44] : memref<8x128xf32, #tpu.memory_space<vmem>>, vector<8x128xf32>
    tpu.vector_store %arg7[%c0_43, %c0_44], %140 {strides = array<i32>} : memref<8x128xf32, #tpu.memory_space<vmem>>, vector<8x128xf32>,
    return
  }
  func.func @transform_0(%arg0: i32) -> (i32, i32) {
    %c0_i32 = arith.constant 0 : i32
    %c0_i32_0 = arith.constant 0 : i32
    return %arg0, %c0_i32 : i32, i32
  }
  func.func @transform_1(%arg0: i32) -> (i32, i32) {
    %c0_i32 = arith.constant 0 : i32
    %c0_i32_0 = arith.constant 0 : i32
    return %arg0, %c0_i32 : i32, i32
  }
  func.func @transform_2(%arg0: i32) -> (i32, i32) {
    %c0_i32 = arith.constant 0 : i32
    %c0_i32_0 = arith.constant 0 : i32
    %c0_i32_1 = arith.constant 0 : i32
    return %c0_i32, %c0_i32_0 : i32, i32
  }
  func.func @transform_3(%arg0: i32) -> (i32, i32) {
    %c0_i32 = arith.constant 0 : i32
    %c0_i32_0 = arith.constant 0 : i32
    %c0_i32_1 = arith.constant 0 : i32
    return %c0_i32, %c0_i32_0 : i32, i32
  }
  func.func @transform_4(%arg0: i32) -> (i32, i32) {
    %c0_i32 = arith.constant 0 : i32
    %c0_i32_0 = arith.constant 0 : i32
    %c0_i32_1 = arith.constant 0 : i32
    return %c0_i32, %c0_i32_0 : i32, i32
  }
  func.func @transform_5(%arg0: i32) -> (i32, i32) {
    %c0_i32 = arith.constant 0 : i32
    %c0_i32_0 = arith.constant 0 : i32
    %c0_i32_1 = arith.constant 0 : i32
    return %c0_i32, %c0_i32_0 : i32, i32
  }
  func.func @transform_6(%arg0: i32) -> (i32, i32) {
    %c0_i32 = arith.constant 0 : i32
    %c0_i32_0 = arith.constant 0 : i32
    return %arg0, %c0_i32 : i32, i32
  }
}

</mosaic_0001>

<bundles_post_ra>
// kernel: tpu_custom_call.1
= control target key start
LH: loop header
LB: loop body
LE: loop exit
PB: predicated region body
PF: predicated region fallthrough
CT: control target
= control target key end

     0   :  { %11 = vsyncpa [#allocation3], 0  ;;  %s2783_s0 = inlined_call_operand.hbm [shape: f32[8,40], index: 0, kind: input, shape index: {}]   ;;  %s2784_s1 = inlined_call_operand.hbm [shape: s32[8,16], index: 1, kind: input, shape index: {}]   ;;  %s2785_s2 = inlined_call_operand.hbm [shape: f32[64,128], index: 2, kind: input, shape index: {}]   ;;  %s2786_s3 = inlined_call_operand.hbm [shape: f32[40,128], index: 3, kind: input, shape index: {}]   ;;  %s2787_s4 = inlined_call_operand.hbm [shape: f32[16,128], index: 4, kind: input, shape index: {}]   ;;  %s2788_s5 = inlined_call_operand.vmem [shape: f32[1,128], index: 5, kind: input, shape index: {}]   ;;  %s2789_s6 = inlined_call_operand.hbm [shape: f32[8,128], index: 6, kind: output, shape index: {}]  }
   0x1   :  { %12 = vsyncpa [#allocation6], 0 }
   0x2   :  { %13 = vsyncpa [#allocation9], 0 }
   0x3   :  { %14 = vsyncpa [#allocation4], 0  ;;  %s2411_s21 = smov [#allocation5]   ;;  %s2271_s25 = scalar_lea.hbm %s2784_s1, 128 }
   0x4   :  { %s31_s22 = sshll.u32 %s2411_s21, 4  ;;  %p2272_p0 = scmp.ne.s32.totalorder %s2784_s1, %s2271_s25  ;;  %s32_s22 = int_to_ptr.vmem [resolvable:$true] %s31_s22 }
   0x5   :  { %p2275_p1 = scmp.lt.u32.totalorder %s2271_s25, %s2784_s1 }
   0x7   :  { %p2277_p2 = pnand %p2275_p1, %p2272_p0 }
   0x9   :  { %2280 = shalt.err (!%p2277_p2)
}
   0xa   :  { %s2281_s30 = scalar_lea.vmem %s32_s22, 128  ;;  %p2286_p4 = scmp.lt.s32.totalorder %s32_s22, %s32_s22 }
   0xb   :  { %p2282_p3 = scmp.ne.s32.totalorder %s32_s22, %s2281_s30  ;;  %p2287_p5 = scmp.lt.s32.totalorder %s2281_s30, %s2281_s30 }
   0xd   :  { %p2288_p6 = por %p2287_p5, %p2286_p4 }
   0xf   :  { %p2289_p7 = pnand %p2288_p6, %p2282_p3 }
  0x11   :  { %2292 = shalt.err (!%p2289_p7)
}
  0x12   :  { %34 = dma.hbm_to_vmem [thread:$0]  %s2784_s1, 128, %s32_s22, [#allocation6]  }
  0x13   :  { %s2412_s9 = smov [#allocation8]   ;;  %s2413_s11 = smov [#allocation2]  }
  0x14   :  { %s52_s10 = sshll.u32 %s2412_s9, 4  ;;  %s21_s12 = sshll.u32 %s2413_s11, 4  ;;  %s53_s10 = int_to_ptr.vmem [resolvable:$true] %s52_s10  ;;  %s22_s12 = int_to_ptr.vmem [resolvable:$true] %s21_s12 }
  0x15   :  { %s2293_s15 = scalar_lea.hbm %s2786_s3, 640 }
  0x16   :  { %p2294_p8 = scmp.ne.s32.totalorder %s2786_s3, %s2293_s15  ;;  %p2297_p9 = scmp.lt.u32.totalorder %s2293_s15, %s2786_s3 }
  0x18   :  { %p2299_p10 = pnand %p2297_p9, %p2294_p8 }
  0x1a   :  { %2302 = shalt.err (!%p2299_p10)
}
  0x1b   :  { %s2303_s1 = scalar_lea.vmem %s53_s10, 640  ;;  %p2308_p12 = scmp.lt.s32.totalorder %s53_s10, %s53_s10 }
  0x1c   :  { %p2304_p11 = scmp.ne.s32.totalorder %s53_s10, %s2303_s1  ;;  %p2309_p13 = scmp.lt.s32.totalorder %s2303_s1, %s2303_s1 }
  0x1e   :  { %p2310_p0 = por %p2309_p13, %p2308_p12 }
  0x20   :  { %p2311_p1 = pnand %p2310_p0, %p2304_p11 }
  0x22   :  { %2314 = shalt.err (!%p2311_p1)
}
  0x23   :  { %s2414_s20 = smov 128   ;;  %s2415_s21 = smov 8  }
  0x24   :  { %58 = dma.hbm_to_vmem [thread:$0]  %s2786_s3, 640, %s53_s10, [#allocation9], %s2414_s20, %s2414_s20, %s2415_s21  }
  0x25   :  { %s2315_s26 = scalar_lea.hbm %s2783_s0, 128 }
  0x26   :  { %p2316_p2 = scmp.ne.s32.totalorder %s2783_s0, %s2315_s26  ;;  %p2319_p3 = scmp.lt.u32.totalorder %s2315_s26, %s2783_s0 }
  0x28   :  { %p2321_p4 = pnand %p2319_p3, %p2316_p2 }
  0x2a   :  { %2324 = shalt.err (!%p2321_p4)
}
  0x2b   :  { %s2325_s7 = scalar_lea.vmem %s22_s12, 128  ;;  %p2330_p6 = scmp.lt.s32.totalorder %s22_s12, %s22_s12 }
  0x2c   :  { %p2326_p5 = scmp.ne.s32.totalorder %s22_s12, %s2325_s7  ;;  %p2331_p7 = scmp.lt.s32.totalorder %s2325_s7, %s2325_s7 }
  0x2e   :  { %p2332_p8 = por %p2331_p7, %p2330_p6 }
  0x30   :  { %p2333_p9 = pnand %p2332_p8, %p2326_p5 }
  0x32   :  { %2336 = shalt.err (!%p2333_p9)
}
  0x33   :  { %24 = dma.hbm_to_vmem [thread:$0]  %s2783_s0, 128, %s22_s12, [#allocation3]  }
  0x34   :  { %s2416_s9 = smov [#allocation7]   ;;  %s2417_s11 = smov [#allocation10]  }
  0x35   :  { %s40_s10 = sshll.u32 %s2416_s9, 4  ;;  %s64_s13 = sshll.u32 %s2417_s11, 4  ;;  %s41_s10 = int_to_ptr.vmem [resolvable:$true] %s40_s10  ;;  %s65_s13 = int_to_ptr.vmem [resolvable:$true] %s64_s13 }
  0x36   :  { %s2337_s16 = scalar_lea.hbm %s2785_s2, 1024 }
  0x37   :  { %p2338_p10 = scmp.ne.s32.totalorder %s2785_s2, %s2337_s16  ;;  %p2341_p11 = scmp.lt.u32.totalorder %s2337_s16, %s2785_s2 }
  0x39   :  { %p2343_p12 = pnand %p2341_p11, %p2338_p10 }
  0x3b   :  { %2346 = shalt.err (!%p2343_p12)
}
  0x3c   :  { %s2347_s0 = scalar_lea.vmem %s41_s10, 1024  ;;  %p2352_p0 = scmp.lt.s32.totalorder %s41_s10, %s41_s10 }
  0x3d   :  { %p2348_p13 = scmp.ne.s32.totalorder %s41_s10, %s2347_s0  ;;  %p2353_p1 = scmp.lt.s32.totalorder %s2347_s0, %s2347_s0 }
  0x3f   :  { %p2354_p2 = por %p2353_p1, %p2352_p0 }
  0x41   :  { %p2355_p3 = pnand %p2354_p2, %p2348_p13 }
  0x43   :  { %2358 = shalt.err (!%p2355_p3)
}
  0x44   :  { %46 = dma.hbm_to_vmem [thread:$0]  %s2785_s2, 1024, %s41_s10, [#allocation6], %s2414_s20, %s2414_s20, %s2415_s21  }
  0x45   :  { %s2359_s25 = scalar_lea.hbm %s2787_s4, 256 }
  0x46   :  { %p2360_p4 = scmp.ne.s32.totalorder %s2787_s4, %s2359_s25  ;;  %p2363_p5 = scmp.lt.u32.totalorder %s2359_s25, %s2787_s4 }
  0x48   :  { %p2365_p6 = pnand %p2363_p5, %p2360_p4 }
  0x4a   :  { %2368 = shalt.err (!%p2365_p6)
}
  0x4b   :  { %s2369_s30 = scalar_lea.vmem %s65_s13, 256  ;;  %p2374_p8 = scmp.lt.s32.totalorder %s65_s13, %s65_s13 }
  0x4c   :  { %p2370_p7 = scmp.ne.s32.totalorder %s65_s13, %s2369_s30  ;;  %p2375_p9 = scmp.lt.s32.totalorder %s2369_s30, %s2369_s30 }
  0x4e   :  { %p2376_p10 = por %p2375_p9, %p2374_p8 }
  0x50   :  { %p2377_p11 = pnand %p2376_p10, %p2370_p7 }
  0x52   :  { %2380 = shalt.err (!%p2377_p11)
}
  0x53   :  { %70 = dma.hbm_to_vmem [thread:$0]  %s2787_s4, 256, %s65_s13, [#allocation9], %s2414_s20, %s2414_s20, %s2415_s21  }
  0x54   :  { %2403 = dma.done.wait [#allocation3], 128  }
  0x55   :  { %2404 = vsyncadd [#allocation3], 4294967168 }
  0x56   :  { %2405 = dma.done.wait [#allocation6], 1152  }
  0x57   :  { %2406 = vsyncadd [#allocation6], 4294966144 }
  0x58   :  { %2407 = dma.done.wait [#allocation9], 896  }
  0x59   :  { %2408 = vsyncadd [#allocation9], 4294966400  ;;  %v2418_v0 = vmov 0   ;;  %v2419_v1 = vmov 1   ;;  %v2420_v2 = vmov 0.0|0.0   ;;  %v2544_v3 = vld [vmem:[#allocation5] sm:$0xff]  ;;  %v103_v20 = vlaneseq }
  0x5a   :  { %2256 = vset.pattern.permute.xlu0 %v2418_v0  ;;  %2258 = vset.pattern.permute.xlu1 %v2419_v1  ;;  %v95_v4 = vld [vmem:[#allocation7] sm:$0xff]  ;;  %v96_v5 = vld [vmem:[#allocation7 + $0x8] sm:$0xff]  ;;  %vm155_vm0 = vcmp.gt.s32.totalorder %v2544_v3, 0  ;;  %v97_v7 = vld [vmem:[#allocation7 + $0x10] sm:$0xff]  ;;  %v2421_v13 = vmov 10   ;;  %v2422_v14 = vmov 11  }
  0x5b   :  { %2033 = vmatprep.subr.bf16.mxu1 %v2420_v2  ;;  %2081 = vmatprep.subr.bf16.mxu0 %v2420_v2  ;;  %v2549_v6 = vpack.c.bf16 %v96_v5, %v95_v4  ;;  %v98_v8 = vld [vmem:[#allocation7 + $0x18] sm:$0xff]  ;;  %v2551_v9 = vsel %vm155_vm0, 1, %v2418_v0  ;;  %v99_v11 = vld [vmem:[#allocation7 + $0x20] sm:$0xff]  ;;  %v100_v12 = vld [vmem:[#allocation7 + $0x28] sm:$0xff]  ;;  %vm2423_vm1 = vmmov 0   ;;  %v2424_v18 = vmov 0.0  }
  0x5c   :  { %157 = vperm.xlu0 %2256, %v2544_v3   ;;  %295 = vperm.xlu1 %2258, %v2544_v3   ;;  %v2554_v10 = vpack.c.bf16 %v98_v8, %v97_v7  ;;  %v2560_v15 = vpack.c.bf16 %v100_v12, %v99_v11  ;;  %v101_v16 = vld [vmem:[#allocation7 + $0x30] sm:$0xff]  ;;  %v102_v17 = vld [vmem:[#allocation7 + $0x38] sm:$0xff]  ;;  %v2573_v21 = vand.u32 127, %v103_v20  ;;  %v2425_v22 = vmov 2   ;;  %v1255_v57 = vld [vmem:[#allocation10] sm:$0xff]  ;;  %s2437_s21 = smov [#allocation11]  }
  0x5d   :  { %2035 = vmatpush3.bf16.msra.mxu1 %v2549_v6  ;;  %1759 = vmatprep.mubr.msk.f32.mxu1 %vm2423_vm1, %v2424_v18  ;;  %v2568_v19 = vpack.c.bf16 %v102_v17, %v101_v16  ;;  %v2426_v23 = vmov 6   ;;  %v2427_v25 = vmov 1.0|1.0   ;;  %v2428_v26 = vmov 13   ;;  %v1256_v58 = vld [vmem:[#allocation10 + $0x8] sm:$0xff]  ;;  %v89_v8 = vld [vmem:[#allocation8] sm:$0xff] }
  0x5e   :  { %2036 = vmatprep.subr.bf16.mxu1 %v2420_v2  ;;  %1848 = vmatprep.mubr.msk.f32.mxu0 %vm2423_vm1, %v2424_v18  ;;  %vm246_vm2 = vcmp.eq.s32.totalorder %v2573_v21, 0  ;;  %v2429_v27 = vmov 12   ;;  %v2430_v28 = vmov 5   ;;  %v2431_v29 = vmov 3   ;;  %v93_v17 = vld [vmem:[#allocation8 + $0x20] sm:$0xff]  ;;  %s1420_s3 = sshll.u32 %s2437_s21, 4  ;;  %s1421_s3 = int_to_ptr.vmem [resolvable:$true] %s1420_s3 }
  0x5f   :  { %vm2578_vm3 = vmpackc.low %vm246_vm2, %vm246_vm2  ;;  %vm254_vm4 = vcmp.eq.s32.totalorder %v2573_v21, 1  ;;  %v2432_v30 = vmov 4   ;;  %v2433_v31 = vmov 14   ;;  %vm167_vm8 = vcmask 523264   ;;  %s2381_s8 = scalar_lea.vmem %s1421_s3, 128  ;;  %p2386_p13 = scmp.lt.s32.totalorder %s1421_s3, %s1421_s3 }
  0x60   :  { %2257 = vset.pattern.permute.xlu0 %v2421_v13  ;;  %2259 = vset.pattern.permute.xlu1 %v2422_v14  ;;  %vm2094_vm5 = vmpackc.low %vm254_vm4, %vm254_vm4  ;;  %vm398_vm12 = vcmp.eq.s32.totalorder %v2573_v21, 2  ;;  %vm406_vm15 = vcmp.eq.s32.totalorder %v2573_v21, 3  ;;  %v2434_v38 = vmov 7   ;;  %v2435_v39 = vmov 9   ;;  %v91_v14 = vld [vmem:[#allocation8 + $0x10] sm:$0xff]  ;;  %p2382_p12 = scmp.ne.s32.totalorder %s1421_s3, %s2381_s8  ;;  %p2387_p0 = scmp.lt.s32.totalorder %s2381_s8, %s2381_s8 }
  0x61   :  { %162 = vperm.xlu0 %2257, %v2551_v9   ;;  %299 = vperm.xlu1 %2259, %v2551_v9   ;;  %vm2058_vm14 = vmpackc.low %vm398_vm12, %vm398_vm12  ;;  %v2436_v40 = vmov 8   ;;  %v2653_v43 = vand.u32 63, %v2573_v21  ;;  %vm690_vm2 = vcmp.eq.s32.totalorder %v2573_v21, 4  ;;  %v2214_v59 = vpack.c.bf16 %v1256_v58, %v1255_v57 }
  0x62   :  { %2038 = vmatpush3.bf16.msra.mxu1 %v2554_v10  ;;  %2083 = vmatpush3.bf16.msk.msra.mxu0 %vm2578_vm3, %v2427_v25  ;;  %vm2070_vm0 = vmpackc.low %vm406_vm15, %vm406_vm15  ;;  %p2388_p1 = por %p2387_p0, %p2386_p13 }
  0x63   :  { %2039 = vmatprep.subr.bf16.mxu1 %v2420_v2  ;;  %2084 = vmatprep.subr.bf16.mxu0 %v2420_v2  ;;  %vm2118_vm4 = vmpackc.low %vm690_vm2, %vm690_vm2 }
  0x64   :  { %p2389_p2 = pnand %p2388_p1, %p2382_p12 }
  0x65   :  { %2261 = vset.pattern.permute.xlu0 %v2425_v22  ;;  %2260 = vset.pattern.permute.xlu1 %v2426_v23  ;;  %v1603_v23 = vld [vmem:[%s2788_s5] ss:$0 sm:$0xff] }
  0x66   :  { %2041 = vmatpush3.bf16.msra.mxu1 %v2560_v15  ;;  %587 = vperm.xlu0 %2261, %v2544_v3  }
  0x67   :  { %2042 = vmatprep.subr.bf16.mxu1 %v2420_v2  ;;  %378 = vperm.xlu1 %2260, %v2544_v3  }
  0x68   :  { %2086 = vmatpush3.bf16.msk.msra.mxu0 %vm2578_vm3, %v2427_v25 }
  0x69   :  { %2087 = vmatprep.subr.bf16.mxu0 %v2420_v2 }
  0x6a   :  { %2044 = vmatpush3.bf16.msra.mxu1 %v2568_v19  ;;  %2264 = vset.pattern.permute.xlu0 %v2428_v26 }
  0x6b   :  { %2045 = vmatprep.subr.bf16.mxu1 %v2420_v2  ;;  %2262 = vset.pattern.permute.xlu1 %v2429_v27 }
  0x6c   :  { %814 = vperm.xlu0 %2264, %v2551_v9   ;;  %591 = vperm.xlu1 %2262, %v2551_v9  }
  0x6d   :  { %2089 = vmatpush3.bf16.msk.msra.mxu0 %vm2578_vm3, %v2427_v25 }
  0x6e   :  { %2090 = vmatprep.subr.bf16.mxu0 %v2420_v2 }
  0x70   :  { %2267 = vset.pattern.permute.xlu0 %v2430_v28  ;;  %2263 = vset.pattern.permute.xlu1 %v2431_v29 }
  0x71   :  { %242 = vperm.xlu0 %2267, %v2544_v3   ;;  %810 = vperm.xlu1 %2263, %v2544_v3  }
  0x72   :  { %2092 = vmatpush3.bf16.msk.msra.mxu0 %vm2578_vm3, %v2427_v25 }
  0x73   :  { %2093 = vmatprep.subr.bf16.mxu0 %v2420_v2 }
  0x75   :  { %2265 = vset.pattern.permute.xlu1 %v2432_v30  ;;  %2270 = vset.pattern.permute.xlu0 %v2435_v39 }
  0x76   :  { %1033 = vperm.xlu1 %2265, %v2544_v3   ;;  %2095 = vmatpush3.bf16.msk.msra.mxu0 %vm2094_vm5, %v2427_v25 }
  0x77   :  { %2096 = vmatprep.subr.bf16.mxu0 %v2420_v2  ;;  %1116 = vperm.xlu0 %2270, %v2544_v3  }
  0x7a   :  { %2266 = vset.pattern.permute.xlu1 %v2433_v31  ;;  %2098 = vmatpush3.bf16.msk.msra.mxu0 %vm2094_vm5, %v2427_v25 }
  0x7b   :  { %1037 = vperm.xlu1 %2266, %v2551_v9   ;;  %2099 = vmatprep.subr.bf16.mxu0 %v2420_v2  ;;  %v90_v9 = vld [vmem:[#allocation8 + $0x8] sm:$0xff] }
  0x7c   :  { %v2217_v11 = vpack.c.bf16 %v90_v9, %v89_v8 }
  0x7e   :  { %2101 = vmatpush3.bf16.msk.msra.mxu0 %vm2094_vm5, %v2427_v25 }
  0x7f   :  { %2102 = vmatprep.subr.bf16.mxu0 %v2420_v2  ;;  %2268 = vset.pattern.permute.xlu1 %v2434_v38 }
  0x80   :  { %670 = vperm.xlu1 %2268, %v2544_v3  }
  0x82   :  { %2104 = vmatpush3.bf16.msk.msra.mxu0 %vm2094_vm5, %v2427_v25 }
  0x83   :  { %2117 = vmatprep.subr.bf16.mxu0 %v2420_v2 }
  0x84   :  { %2269 = vset.pattern.permute.xlu1 %v2436_v40 }
  0x85   :  { %893 = vperm.xlu1 %2269, %v2544_v3  }
  0xdb   :  { %v158_v32 = vpop.permute.xlu0 %157  ;;  %v296_v35 = vpop.permute.xlu1 %295 }
  0xdc   :  { %vm159_vm6 = vcmp.eq.s32.totalorder %v2573_v21, %v158_v32  ;;  %vm297_vm10 = vcmp.eq.s32.totalorder %v2573_v21, %v296_v35 }
  0xe0   :  { %v163_v33 = vpop.permute.xlu0 %162  ;;  %v300_v36 = vpop.permute.xlu1 %299 }
  0xe1   :  { %vm164_vm7 = vcmp.eq.s32.totalorder %v163_v33, 1  ;;  %vm301_vm11 = vcmp.eq.s32.totalorder %v300_v36, 1 }
  0xe2   :  { %vm165_vm9 = vmand %vm159_vm6, %vm164_vm7 }
  0xe3   :  { %v166_v34 = vsel %vm165_vm9, 1.0, %v2424_v18  ;;  %vm302_vm13 = vmand %vm297_vm10, %vm301_vm11 }
  0xe4   :  { %1760 = vmatmul.mubr.msk.f32.vlgmr.msra.gmra.mrb[0].mxu1 %vm167_vm8, %v166_v34  ;;  %v303_v37 = vsel %vm302_vm13, 1.0, %v2424_v18 }
  0xe5   :  { %2047 = vmatpush3.bf16.msra.mxu1 %v2549_v6  ;;  %1778 = vmatprep.mubr.msk.f32.mxu1 %vm2423_vm1, %v2424_v18  ;;  %v588_v41 = vpop.permute.xlu0 %587 }
  0xe6   :  { %2048 = vmatprep.subr.bf16.mxu1 %v2420_v2  ;;  %v379_v47 = vpop.permute.xlu1 %378  ;;  %vm589_vm6 = vcmp.eq.s32.totalorder %v2573_v21, %v588_v41 }
  0xe7   :  { %vm380_vm5 = vcmp.eq.s32.totalorder %v2653_v43, %v379_v47 }
  0xe9   :  { %2050 = vmatpush3.bf16.msra.mxu1 %v2554_v10 }
  0xea   :  { %2051 = vmatprep.subr.bf16.mxu1 %v2420_v2 }
  0xeb   :  { %v815_v42 = vpop.permute.xlu0 %814  ;;  %v592_v50 = vpop.permute.xlu1 %591 }
  0xec   :  { %vm593_vm7 = vcmp.eq.s32.totalorder %v592_v50, 1  ;;  %vm816_vm10 = vcmp.eq.s32.totalorder %v815_v42, 1 }
  0xed   :  { %2053 = vmatpush3.bf16.msra.mxu1 %v2560_v15  ;;  %vm594_vm9 = vmand %vm589_vm6, %vm593_vm7  ;;  %vm1136_vm7 = vcmp.eq.s32.totalorder %v2573_v21, 8 }
  0xee   :  { %2054 = vmatprep.subr.bf16.mxu1 %v2420_v2  ;;  %v595_v51 = vsel %vm594_vm9, 1.0, %v2424_v18 }
  0xf0   :  { %v243_v44 = vpop.permute.xlu0 %242  ;;  %v811_v52 = vpop.permute.xlu1 %810 }
  0xf1   :  { %2056 = vmatpush3.bf16.msra.mxu1 %v2568_v19  ;;  %vm244_vm3 = vcmp.eq.s32.totalorder %v2653_v43, %v243_v44  ;;  %vm812_vm11 = vcmp.eq.s32.totalorder %v2573_v21, %v811_v52 }
  0xf2   :  { %2057 = vmatprep.subr.bf16.mxu1 %v2420_v2  ;;  %vm817_vm12 = vmand %vm812_vm11, %vm816_vm10  ;;  %vm1144_vm11 = vcmp.eq.s32.totalorder %v2573_v21, 9 }
  0xf3   :  { %v818_v53 = vsel %vm817_vm12, 1.0, %v2424_v18  ;;  %vm2190_vm10 = vmpackc.low %vm1136_vm7, %vm1136_vm7 }
  0xf4   :  { %1779 = vmatmul.mubr.msk.f32.vlgmr.msra.gmra.mrb[2].mxu1 %vm167_vm8, %v303_v37  ;;  %vm2202_vm12 = vmpackc.low %vm1144_vm11, %vm1144_vm11 }
  0xf5   :  { %2059 = vmatpush3.bf16.msk.msra.mxu1 %vm2058_vm14, %v2427_v25  ;;  %1813 = vmatprep.mubr.msk.f32.mxu1 %vm2423_vm1, %v2424_v18  ;;  %v1034_v54 = vpop.permute.xlu1 %1033 }
  0xf6   :  { %2060 = vmatprep.subr.bf16.mxu1 %v2420_v2  ;;  %vm1035_vm13 = vcmp.eq.s32.totalorder %v2573_v21, %v1034_v54  ;;  %v1117_v7 = vpop.permute.xlu0 %1116 }
  0xf9   :  { %2062 = vmatpush3.bf16.msk.msra.mxu1 %vm2058_vm14, %v2427_v25 }
  0xfa   :  { %2063 = vmatprep.subr.bf16.mxu1 %v2420_v2  ;;  %v1038_v55 = vpop.permute.xlu1 %1037 }
  0xfd   :  { %2065 = vmatpush3.bf16.msk.msra.mxu1 %vm2058_vm14, %v2427_v25 }
  0xfe   :  { %2066 = vmatprep.subr.bf16.mxu1 %v2420_v2 }
  0xff   :  { %v671_v62 = vpop.permute.xlu1 %670 }
 0x101   :  { %2068 = vmatpush3.bf16.msk.msra.mxu1 %vm2058_vm14, %v2427_v25  ;;  %vm1039_vm14 = vcmp.eq.s32.totalorder %v1038_v55, 1 }
 0x102   :  { %2069 = vmatprep.subr.bf16.mxu1 %v2420_v2  ;;  %vm1040_vm15 = vmand %vm1035_vm13, %vm1039_vm14  ;;  %vm1118_vm13 = vcmp.eq.s32.totalorder %v2653_v43, %v1117_v7  ;;  %vm1257_vm14 = vcmask 130048  }
 0x103   :  { %v1041_v56 = vsel %vm1040_vm15, 1.0, %v2424_v18  ;;  %vm1331_vm15 = vcmask 326656  }
 0x104   :  { %v894_v4 = vpop.permute.xlu1 %893 }
 0x105   :  { %2071 = vmatpush3.bf16.msk.msra.mxu1 %vm2070_vm0, %v2427_v25  ;;  %vm895_vm9 = vcmp.eq.s32.totalorder %v2653_v43, %v894_v4 }
 0x106   :  { %2072 = vmatprep.subr.bf16.mxu1 %v2420_v2 }
 0x109   :  { %2074 = vmatpush3.bf16.msk.msra.mxu1 %vm2070_vm0, %v2427_v25 }
 0x10a   :  { %2075 = vmatprep.subr.bf16.mxu1 %v2420_v2 }
 0x10d   :  { %2077 = vmatpush3.bf16.msk.msra.mxu1 %vm2070_vm0, %v2427_v25 }
 0x10e   :  { %2078 = vmatprep.subr.bf16.mxu1 %v2420_v2 }
 0x111   :  { %2080 = vmatpush3.bf16.msk.msra.mxu1 %vm2070_vm0, %v2427_v25  ;;  %vm698_vm0 = vcmp.eq.s32.totalorder %v2573_v21, 5 }
 0x112   :  { %2105 = vmatprep.subr.bf16.mxu1 %v2420_v2  ;;  %vm2130_vm2 = vmpackc.low %vm698_vm0, %vm698_vm0 }
 0x1b7   :  { %v237_v45 = vpop.f32.mrb[0].mxu1 }
 0x1b8   :  { %v1761_v46 = vpop.f32.mrb[1].mxu1  ;;  %1849 = vmatmul.mubr.msk.f32.vlgmr.msra.gmra.mrb[0].mxu0 %vm244_vm3, %v237_v45  ;;  %vm672_vm3 = vcmp.eq.s32.totalorder %v2653_v43, %v671_v62 }
 0x1b9   :  { %2119 = vmatpush3.bf16.msk.msra.mxu0 %vm2118_vm4, %v2427_v25  ;;  %1902 = vmatprep.mubr.msk.f32.mxu0 %vm2423_vm1, %v2424_v18 }
 0x1ba   :  { %2120 = vmatprep.subr.bf16.mxu0 %v2420_v2 }
 0x1bd   :  { %2122 = vmatpush3.bf16.msk.msra.mxu0 %vm2118_vm4, %v2427_v25 }
 0x1be   :  { %2123 = vmatprep.subr.bf16.mxu0 %v2420_v2 }
 0x1c1   :  { %2125 = vmatpush3.bf16.msk.msra.mxu0 %vm2118_vm4, %v2427_v25 }
 0x1c2   :  { %2126 = vmatprep.subr.bf16.mxu0 %v2420_v2 }
 0x1c5   :  { %2128 = vmatpush3.bf16.msk.msra.mxu0 %vm2118_vm4, %v2427_v25 }
 0x1c6   :  { %2129 = vmatprep.subr.bf16.mxu0 %v2420_v2 }
 0x1c7   :  { %v373_v48 = vpop.f32.mrb[2].mxu1 }
 0x1c8   :  { %v1780_v49 = vpop.f32.mrb[3].mxu1  ;;  %1814 = vmatmul.mubr.msk.f32.vlgmr.msra.gmra.mrb[4].mxu1 %vm380_vm5, %v373_v48  ;;  %vm921_vm5 = vcmp.eq.s32.totalorder %v2573_v21, 7 }
 0x1c9   :  { %2107 = vmatpush3.bf16.msra.mxu1 %v2549_v6  ;;  %1867 = vmatprep.mubr.msk.f32.mxu1 %vm2423_vm1, %v2424_v18  ;;  %vm2166_vm6 = vmpackc.low %vm921_vm5, %vm921_vm5 }
 0x1ca   :  { %2108 = vmatprep.subr.bf16.mxu1 %v2420_v2  ;;  %2131 = vmatpush3.bf16.msk.msra.mxu0 %vm2130_vm2, %v2427_v25 }
 0x1cb   :  { %2132 = vmatprep.subr.bf16.mxu0 %v2420_v2 }
 0x1cd   :  { %2110 = vmatpush3.bf16.msra.mxu1 %v2554_v10 }
 0x1ce   :  { %2111 = vmatprep.subr.bf16.mxu1 %v2420_v2  ;;  %2134 = vmatpush3.bf16.msk.msra.mxu0 %vm2130_vm2, %v2427_v25 }
 0x1cf   :  { %2135 = vmatprep.subr.bf16.mxu0 %v2420_v2 }
 0x1d1   :  { %2113 = vmatpush3.bf16.msra.mxu1 %v2560_v15 }
 0x1d2   :  { %2114 = vmatprep.subr.bf16.mxu1 %v2420_v2  ;;  %2137 = vmatpush3.bf16.msk.msra.mxu0 %vm2130_vm2, %v2427_v25 }
 0x1d3   :  { %2138 = vmatprep.subr.bf16.mxu0 %v2420_v2 }
 0x1d5   :  { %2116 = vmatpush3.bf16.msra.mxu1 %v2568_v19 }
 0x1d6   :  { %2141 = vmatprep.subr.bf16.mxu1 %v2420_v2  ;;  %2140 = vmatpush3.bf16.msk.msra.mxu0 %vm2130_vm2, %v2427_v25 }
 0x1d7   :  { %2153 = vmatprep.subr.bf16.mxu0 %v2420_v2 }
 0x1d8   :  { %1868 = vmatmul.mubr.msk.f32.vlgmr.msra.gmra.mrb[6].mxu1 %vm167_vm8, %v595_v51 }
 0x1d9   :  { %2143 = vmatpush3.bf16.msra.mxu1 %v2549_v6  ;;  %1921 = vmatprep.mubr.msk.f32.mxu1 %vm2423_vm1, %v2424_v18 }
 0x1da   :  { %2144 = vmatprep.subr.bf16.mxu1 %v2420_v2 }
 0x1dd   :  { %2146 = vmatpush3.bf16.msra.mxu1 %v2554_v10 }
 0x1de   :  { %2147 = vmatprep.subr.bf16.mxu1 %v2420_v2 }
 0x1e1   :  { %2149 = vmatpush3.bf16.msra.mxu1 %v2560_v15 }
 0x1e2   :  { %2150 = vmatprep.subr.bf16.mxu1 %v2420_v2 }
 0x1e5   :  { %2152 = vmatpush3.bf16.msra.mxu1 %v2568_v19 }
 0x1e6   :  { %2177 = vmatprep.subr.bf16.mxu1 %v2420_v2 }
 0x1e8   :  { %1922 = vmatmul.mubr.msk.f32.vlgmr.msra.gmra.mrb[8].mxu1 %vm167_vm8, %v818_v53 }
 0x1e9   :  { %2179 = vmatpush3.bf16.msra.mxu1 %v2549_v6  ;;  %1975 = vmatprep.mubr.msk.f32.mxu1 %vm2423_vm1, %v2424_v18 }
 0x1ea   :  { %2180 = vmatprep.subr.bf16.mxu1 %v2420_v2 }
 0x1ed   :  { %2182 = vmatpush3.bf16.msra.mxu1 %v2554_v10 }
 0x1ee   :  { %2183 = vmatprep.subr.bf16.mxu1 %v2420_v2 }
 0x1f1   :  { %2185 = vmatpush3.bf16.msra.mxu1 %v2560_v15  ;;  %v92_v15 = vld [vmem:[#allocation8 + $0x18] sm:$0xff] }
 0x1f2   :  { %2186 = vmatprep.subr.bf16.mxu1 %v2420_v2  ;;  %v2220_v16 = vpack.c.bf16 %v92_v15, %v91_v14 }
 0x1f5   :  { %2188 = vmatpush3.bf16.msra.mxu1 %v2568_v19  ;;  %v88_v19 = vld [vmem:[#allocation2] sm:$0xff] }
 0x1f6   :  { %2213 = vmatprep.subr.bf16.mxu1 %v2420_v2 }
 0x1f8   :  { %1976 = vmatmul.mubr.msk.f32.vlgmr.msra.gmra.mrb[10].mxu1 %vm167_vm8, %v1041_v56  ;;  %vm913_vm8 = vcmp.eq.s32.totalorder %v2573_v21, 6 }
 0x1f9   :  { %2017 = vmatprep.mubr.msk.f32.mxu1 %vm2423_vm1, %v2424_v18  ;;  %2215 = vmatpush3.bf16.msra.mxu1 %v2214_v59  ;;  %vm2154_vm4 = vmpackc.low %vm913_vm8, %vm913_vm8 }
 0x1fa   :  { %2216 = vmatprep.subr.bf16.mxu1 %v2420_v2 }
 0x29b   :  { %v2719_v60 = vpop.f32.mrb[4].mxu1 }
 0x29c   :  { %v1815_v61 = vpop.f32.mrb[5].mxu1 }
 0x2ab   :  { %v665_v63 = vpop.f32.mrb[6].mxu1 }
 0x2ac   :  { %v1869_v0 = vpop.f32.mrb[7].mxu1  ;;  %1903 = vmatmul.mubr.msk.f32.vlgmr.msra.gmra.mrb[0].mxu0 %vm672_vm3, %v665_v63 }
 0x2ad   :  { %2155 = vmatpush3.bf16.msk.msra.mxu0 %vm2154_vm4, %v2427_v25  ;;  %1956 = vmatprep.mubr.msk.f32.mxu0 %vm2423_vm1, %v2424_v18 }
 0x2ae   :  { %2156 = vmatprep.subr.bf16.mxu0 %v2420_v2 }
 0x2b1   :  { %2158 = vmatpush3.bf16.msk.msra.mxu0 %vm2154_vm4, %v2427_v25 }
 0x2b2   :  { %2159 = vmatprep.subr.bf16.mxu0 %v2420_v2 }
 0x2b5   :  { %2161 = vmatpush3.bf16.msk.msra.mxu0 %vm2154_vm4, %v2427_v25 }
 0x2b6   :  { %2162 = vmatprep.subr.bf16.mxu0 %v2420_v2 }
 0x2b9   :  { %2164 = vmatpush3.bf16.msk.msra.mxu0 %vm2154_vm4, %v2427_v25 }
 0x2ba   :  { %2165 = vmatprep.subr.bf16.mxu0 %v2420_v2 }
 0x2bb   :  { %v888_v1 = vpop.f32.mrb[8].mxu1 }
 0x2bc   :  { %v1923_v3 = vpop.f32.mrb[9].mxu1 }
 0x2bd   :  { %2167 = vmatpush3.bf16.msk.msra.mxu0 %vm2166_vm6, %v2427_v25 }
 0x2be   :  { %2168 = vmatprep.subr.bf16.mxu0 %v2420_v2 }
 0x2c1   :  { %2170 = vmatpush3.bf16.msk.msra.mxu0 %vm2166_vm6, %v2427_v25 }
 0x2c2   :  { %2171 = vmatprep.subr.bf16.mxu0 %v2420_v2 }
 0x2c5   :  { %2173 = vmatpush3.bf16.msk.msra.mxu0 %vm2166_vm6, %v2427_v25 }
 0x2c6   :  { %2174 = vmatprep.subr.bf16.mxu0 %v2420_v2 }
 0x2c9   :  { %2176 = vmatpush3.bf16.msk.msra.mxu0 %vm2166_vm6, %v2427_v25 }
 0x2ca   :  { %2189 = vmatprep.subr.bf16.mxu0 %v2420_v2 }
 0x2cb   :  { %v1111_v5 = vpop.f32.mrb[10].mxu1 }
 0x2cc   :  { %1957 = vmatmul.mubr.msk.f32.vlgmr.msra.gmra.mrb[0].mxu0 %vm895_vm9, %v888_v1  ;;  %v1977_v6 = vpop.f32.mrb[11].mxu1 }
 0x2cd   :  { %2191 = vmatpush3.bf16.msk.msra.mxu0 %vm2190_vm10, %v2427_v25  ;;  %2010 = vmatprep.mubr.msk.f32.mxu0 %vm2423_vm1, %v2424_v18 }
 0x2ce   :  { %2192 = vmatprep.subr.bf16.mxu0 %v2420_v2 }
 0x2d1   :  { %2194 = vmatpush3.bf16.msk.msra.mxu0 %vm2190_vm10, %v2427_v25 }
 0x2d2   :  { %2195 = vmatprep.subr.bf16.mxu0 %v2420_v2 }
 0x2d5   :  { %2197 = vmatpush3.bf16.msk.msra.mxu0 %vm2190_vm10, %v2427_v25 }
 0x2d6   :  { %2198 = vmatprep.subr.bf16.mxu0 %v2420_v2 }
 0x2d9   :  { %2200 = vmatpush3.bf16.msk.msra.mxu0 %vm2190_vm10, %v2427_v25 }
 0x2da   :  { %2201 = vmatprep.subr.bf16.mxu0 %v2420_v2 }
 0x2dd   :  { %2203 = vmatpush3.bf16.msk.msra.mxu0 %vm2202_vm12, %v2427_v25 }
 0x2de   :  { %2204 = vmatprep.subr.bf16.mxu0 %v2420_v2 }
 0x2e1   :  { %2206 = vmatpush3.bf16.msk.msra.mxu0 %vm2202_vm12, %v2427_v25 }
 0x2e2   :  { %2207 = vmatprep.subr.bf16.mxu0 %v2420_v2 }
 0x2e5   :  { %2209 = vmatpush3.bf16.msk.msra.mxu0 %vm2202_vm12, %v2427_v25 }
 0x2e6   :  { %2210 = vmatprep.subr.bf16.mxu0 %v2420_v2 }
 0x2e9   :  { %2212 = vmatpush3.bf16.msk.msra.mxu0 %vm2202_vm12, %v2427_v25 }
 0x2ec   :  { %2011 = vmatmul.mubr.msk.f32.vlgmr.msra.gmra.mrb[0].mxu0 %vm1118_vm13, %v1111_v5 }
 0x3bf   :  { %v1250_v10 = vpop.f32.mrb[0].mxu0 }
 0x3c0   :  { %v2222_v12 = vadd.f32 %v1250_v10, %v2719_v60  ;;  %v2012_v13 = vpop.f32.mrb[1].mxu0 }
 0x3c2   :  { %2018 = vmatmul.mubr.msk.f32.vlgmr.msra.gmra.mrb[12].mxu1 %vm1257_vm14, %v2222_v12 }
 0x3c3   :  { %2218 = vmatpush3.bf16.msra.mxu1 %v2217_v11  ;;  %2030 = vmatprep.mubr.msk.f32.mxu1 %vm2423_vm1, %v2424_v18 }
 0x3c4   :  { %2219 = vmatprep.subr.bf16.mxu1 %v2420_v2 }
 0x3c7   :  { %2221 = vmatpush3.bf16.msra.mxu1 %v2220_v16 }
 0x3c8   :  { %2028 = vmatprep.subr.mxu1 %v2424_v18 }
 0x3cb   :  { %2029 = vmatpush3.msra.mxu1 %v93_v17 }
 0x3cc   :  { %2031 = vmatmul.mubr.msk.f32.vlgmr.msra.gmra.mrb[14].mxu1 %vm1331_vm15, %v88_v19 }
 0x495   :  { %v1327_v20 = vpop.f32.mrb[12].mxu1 }
 0x496   :  { %v2019_v21 = vpop.f32.mrb[13].mxu1 }
 0x49f   :  { %v1401_v22 = vpop.f32.mrb[14].mxu1 }
 0x4a0   :  { %v1402_v24 = vadd.f32 %v1401_v22, %v1327_v20  ;;  %v2032_v25 = vpop.f32.mrb[15].mxu1 }
 0x4a2   :  { %v1412_v2 = vadd.f32 %v1603_v23, %v1402_v24 }
 0x4a4   :  { %1413 = vst [vmem:[#allocation11] sm:$0xff] %v1412_v2 }
 0x4a5   :  { %2392 = shalt.err (!%p2389_p2)
}
 0x4a6   :  { %s2393_s11 = scalar_lea.hbm %s2789_s6, 128 }
 0x4a7   :  { %p2394_p3 = scmp.ne.s32.totalorder %s2789_s6, %s2393_s11  ;;  %p2397_p4 = scmp.lt.u32.totalorder %s2393_s11, %s2789_s6 }
 0x4a9   :  { %p2399_p5 = pnand %p2397_p4, %p2394_p3 }
 0x4ab   :  { %2402 = shalt.err (!%p2399_p5)
}
 0x4ac   :  { %1423 = dma.vmem_to_hbm [thread:$0]  %s1421_s3, 128, %s2789_s6, [#allocation4]  }
 0x4ad   :  { %2409 = dma.done.wait [#allocation4], 128  }
 0x4ae   :  { %2410 = vsyncadd [#allocation4], 4294967168 }
 0x4af   :  { %1427 = vsyncpa [#allocation3], 1 }
 0x4b0   :  { %1428 = vsyncpa [#allocation6], 1 }
 0x4b1   :  { %1429 = vsyncpa [#allocation9], 1 }
 0x4b2   :  { %1430 = vsyncpa [#allocation4], 1 }

</bundles_post_ra>
